<compile_context>
chip_gen: v7x
topology: tpu7x:2x2x1
jax: 0.10.0
libtpu: 0.0.40
codegen_flags: <defaults>
</compile_context>

<pallas_src>
import functools
import math

import jax
import jax.numpy as jnp
from jax.experimental import pallas as pl
from jax.experimental.pallas import tpu as pltpu

_INV_SQRT2 = 1.0 / math.sqrt(2.0)
_SQRT_2_OVER_PI = math.sqrt(2.0 / math.pi)
_LN_EPS = 1e-5


def _round_up(a: int, b: int) -> int:
    return (a + b - 1) // b * b


def _vmem_capacity_bytes() -> int:
    try:
        return int(pltpu.get_tpu_info().vmem_capacity_bytes)
    except Exception:
        return 64 * 1024 * 1024  # conservative fallback (v7x per-TC VMEM)


def _epilogue(e1, w2_ref, g_ref, b_ref, o_ref, *, d_out, d_out_p, approximate):
    """GELU -> linear2 -> residual -> LayerNorm, all on the resident f32 tile."""
    if approximate:
        # tanh GELU -> EUP slot (essentially free next to MXU work); gated behind
        # a flag since it is ~1e-3 off torch's exact-erf default.
        inner = _SQRT_2_OVER_PI * (e1 + 0.044715 * e1 * e1 * e1)
        h = 0.5 * e1 * (1.0 + jnp.tanh(inner))
    else:
        h = 0.5 * e1 * (1.0 + jax.lax.erf(e1 * _INV_SQRT2))

    # linear2 (needs full d_out rows, so only d_in is ever K-tiled).
    e2 = jnp.dot(h.astype(w2_ref.dtype), w2_ref[...],
                 preferred_element_type=jnp.float32)

    # TODO(synk): dropout is eval-mode identity (training-mode p=0.5 masking
    # would need pltpu.prng_* and cannot match torch RNG anyway).
    y = e1 + e2

    # Two-pass LayerNorm over the real d_out columns.  Padded columns of y are
    # exact zeros (weights are zero-padded), so sum(y) over the padded axis is
    # correct; the centered pass masks padded columns explicitly.
    inv_d = 1.0 / float(d_out)
    mean = jnp.sum(y, axis=-1, keepdims=True) * inv_d
    diff = y - mean
    if d_out_p != d_out:
        col = jax.lax.broadcasted_iota(jnp.int32, y.shape, 1)
        diff = jnp.where(col < d_out, diff, 0.0)
    var = jnp.sum(diff * diff, axis=-1, keepdims=True) * inv_d
    yn = diff * jax.lax.rsqrt(var + _LN_EPS)

    out = yn * g_ref[...].astype(jnp.float32) + b_ref[...].astype(jnp.float32)
    o_ref[...] = out.astype(o_ref.dtype)


def _projection_kernel_1k(x_ref, w1_ref, w2_ref, g_ref, b_ref, o_ref, *,
                          d_out, d_out_p, approximate):
    """W1 fully resident: 1-D grid over row tiles, no accumulator scratch."""
    e1 = jnp.dot(x_ref[...], w1_ref[...], preferred_element_type=jnp.float32)
    _epilogue(e1, w2_ref, g_ref, b_ref, o_ref,
              d_out=d_out, d_out_p=d_out_p, approximate=approximate)


def _projection_kernel_kt(x_ref, w1_ref, w2_ref, g_ref, b_ref, o_ref, acc_ref, *,
                          d_out, d_out_p, approximate):
    """d_in reduction as innermost grid axis with an f32 VMEM accumulator."""
    k = pl.program_id(1)

    @pl.when(k == 0)
    def _init():
        acc_ref[...] = jnp.zeros_like(acc_ref)

    acc_ref[...] += jnp.dot(x_ref[...], w1_ref[...],
                            preferred_element_type=jnp.float32)

    @pl.when(k == pl.num_programs(1) - 1)
    def _finalize():
        _epilogue(acc_ref[...], w2_ref, g_ref, b_ref, o_ref,
                  d_out=d_out, d_out_p=d_out_p, approximate=approximate)


def projection_forward(x, w1_t, w2_t, gamma, beta, *, tm=None, tk=None,
                       approximate=False, vmem_limit_bytes=None,
                       allow_w1_resident=True):
    """Fused Projection forward.  x: (..., d_in) -> (..., d_out).

    w1_t: (d_in, d_out)   = linear1.weight.T
    w2_t: (d_out, d_out)  = linear2.weight.T
    gamma, beta: (d_out,) = LayerNorm affine parameters.
    tm / tk = None means auto-pick tile sizes from the VMEM budget.
    """
    d_in = x.shape[-1]
    d_out = w1_t.shape[-1]
    assert w1_t.shape == (d_in, d_out)
    assert w2_t.shape == (d_out, d_out)
    assert gamma.shape == (d_out,) and beta.shape == (d_out,)

    lead_shape = x.shape[:-1]
    n = int(math.prod(lead_shape)) if lead_shape else 1
    x2 = x.reshape(n, d_in)

    # ---- lane-dense feature padding targets -------------------------------
    d_out_p = _round_up(d_out, 128)
    d_in_p0 = _round_up(d_in, 128)

    in_itemsize = jnp.dtype(x.dtype).itemsize
    w_itemsize = jnp.dtype(w1_t.dtype).itemsize
    # dtype-native sublane multiple: 8 for f32, 16 for bf16, 32 for int8.
    sublane = max(8, 32 // max(in_itemsize, 1))

    # ---- generation-aware VMEM budget --------------------------------------
    capacity = _vmem_capacity_bytes()          # 64 MiB (v7x/TC) or 128 MiB (v5e/v6e)
    budget = capacity * 3 // 4                 # 48 MiB on v7x, 96 MiB on v5e/v6e

    # ---- d_in (k) tiling: keep W1 resident when it fits --------------------
    w1_bytes = d_in_p0 * d_out_p * w_itemsize
    w1_resident_cap = min(budget // 3, 16 << 20)
    if allow_w1_resident and w1_bytes <= w1_resident_cap:
        k_tiles = 1
        tk_eff = d_in_p0
    else:
        tk_req = 512 if tk is None else tk
        tk_eff = min(_round_up(max(tk_req, 128), 128), d_in_p0)
        if tk is None:
            # auto-grow tk a bit for large d_in (fewer grid steps), keeping the
            # double-buffered W1 tile within ~1/4 of the budget.
            while (tk_eff < 1024 and tk_eff * 2 <= d_in_p0
                   and 2 * (tk_eff * 2) * d_out_p * w_itemsize <= budget // 4):
                tk_eff *= 2
        k_tiles = pl.cdiv(d_in_p0, tk_eff)
        tk_eff = _round_up(pl.cdiv(d_in_p0, k_tiles), 128)
        k_tiles = pl.cdiv(d_in_p0, tk_eff)
    d_in_p = tk_eff * k_tiles

    # Single-buffer grid-invariant operands only when W2 is big enough to matter.
    single_buffer_invariants = d_out_p * d_out_p * w_itemsize >= (4 << 20)
    w2_bufs = 1 if single_buffer_invariants else 2

    def vmem_estimate(tm_rows):
        acc = (tm_rows * d_out_p * 4) if k_tiles > 1 else 0
        return (2 * tm_rows * tk_eff * in_itemsize           # x tile (double-buffered)
                + 2 * tk_eff * d_out_p * w_itemsize          # W1 tile
                + w2_bufs * d_out_p * d_out_p * w_itemsize   # W2
                + 2 * tm_rows * d_out_p * in_itemsize        # out tile
                + acc                                        # accumulator scratch
                + 4 * tm_rows * d_out_p * 4                  # e1/h/e2/y temporaries
                + 4 * d_out_p * 4                            # gamma/beta
                + (2 << 20))                                 # slack

    # ---- row tiling ---------------------------------------------------------
    n_sub = _round_up(n, sublane)
    # keep >= 2 row tiles when the row count allows it, so v7x's second
    # TensorCore (row axis is "parallel") always has work; cheap on 1-TC chips.
    if n_sub > sublane:
        row_cap = max(sublane, _round_up(pl.cdiv(n_sub, 2), sublane))
    else:
        row_cap = n_sub

    tm_req = 256 if tm is None else tm
    tm_req_r = _round_up(max(tm_req, sublane), sublane)
    tm_eff = min(tm_req_r, row_cap)
    if tm is None:
        tm_eff = max(tm_eff, min(row_cap, 128))      # prefer full-MXU M when possible
        grow_cap = min(row_cap, 1024)
    else:
        grow_cap = min(tm_req_r, row_cap)
    # grow within the budget (less W1 re-streaming, fewer grid steps) ...
    while tm_eff * 2 <= grow_cap and vmem_estimate(tm_eff * 2) <= budget:
        tm_eff *= 2
    # ... then shrink if still over budget.
    while vmem_estimate(tm_eff) > budget and tm_eff > sublane:
        tm_eff = _round_up(max(sublane, tm_eff // 2), sublane)

    n_pad = _round_up(n, tm_eff)
    row_tiles = n_pad // tm_eff

    # ---- zero-pad operands only when needed (padded rows/cols are exact 0) --
    if n_pad == n and d_in_p == d_in:
        xp = x2
    else:
        xp = jnp.zeros((n_pad, d_in_p), x.dtype).at[:n, :d_in].set(x2)
    if d_in_p == d_in and d_out_p == d_out:
        w1p = w1_t
    else:
        w1p = jnp.zeros((d_in_p, d_out_p), w1_t.dtype).at[:d_in, :d_out].set(w1_t)
    if d_out_p == d_out:
        w2p = w2_t
        gp = gamma.reshape(1, d_out)
        bp = beta.reshape(1, d_out)
    else:
        w2p = jnp.zeros((d_out_p, d_out_p), w2_t.dtype).at[:d_out, :d_out].set(w2_t)
        gp = jnp.zeros((1, d_out_p), gamma.dtype).at[0, :d_out].set(gamma)
        bp = jnp.zeros((1, d_out_p), beta.dtype).at[0, :d_out].set(beta)

    if vmem_limit_bytes is None:
        vmem_limit_bytes = int(min(max(vmem_estimate(tm_eff) + (8 << 20), 48 << 20),
                                   capacity))

    def _invariant_spec(shape, index_map):
        if single_buffer_invariants:
            return pl.BlockSpec(shape, index_map, pipeline_mode=pl.Buffered(1))
        return pl.BlockSpec(shape, index_map)

    if k_tiles == 1:
        kernel = functools.partial(_projection_kernel_1k, d_out=d_out,
                                   d_out_p=d_out_p, approximate=approximate)
        grid = (row_tiles,)
        in_specs = [
            pl.BlockSpec((tm_eff, tk_eff), lambda i: (i, 0)),        # x tile
            pl.BlockSpec((tk_eff, d_out_p), lambda i: (0, 0)),       # W1 (resident)
            _invariant_spec((d_out_p, d_out_p), lambda i: (0, 0)),   # W2
            _invariant_spec((1, d_out_p), lambda i: (0, 0)),         # gamma
            _invariant_spec((1, d_out_p), lambda i: (0, 0)),         # beta
        ]
        out_specs = pl.BlockSpec((tm_eff, d_out_p), lambda i: (i, 0))
        scratch_shapes = ()
        dim_sem = ("parallel",)
    else:
        kernel = functools.partial(_projection_kernel_kt, d_out=d_out,
                                   d_out_p=d_out_p, approximate=approximate)
        grid = (row_tiles, k_tiles)
        in_specs = [
            pl.BlockSpec((tm_eff, tk_eff), lambda i, k: (i, k)),         # x tile
            pl.BlockSpec((tk_eff, d_out_p), lambda i, k: (k, 0)),        # W1 tile
            _invariant_spec((d_out_p, d_out_p), lambda i, k: (0, 0)),    # W2
            _invariant_spec((1, d_out_p), lambda i, k: (0, 0)),          # gamma
            _invariant_spec((1, d_out_p), lambda i, k: (0, 0)),          # beta
        ]
        out_specs = pl.BlockSpec((tm_eff, d_out_p), lambda i, k: (i, 0))
        scratch_shapes = (pltpu.VMEM((tm_eff, d_out_p), jnp.float32),)
        dim_sem = ("parallel", "arbitrary")

    w1_streams = 1 if k_tiles == 1 else row_tiles
    cost = pl.CostEstimate(
        flops=2 * n * d_in * d_out + 2 * n * d_out * d_out,
        transcendentals=n * d_out,
        bytes_accessed=int(n_pad * d_in_p * in_itemsize
                           + w1_streams * d_in_p * d_out_p * w_itemsize
                           + d_out_p * d_out_p * w_itemsize
                           + 2 * d_out_p * 4
                           + n_pad * d_out_p * in_itemsize),
    )

    out = pl.pallas_call(
        kernel,
        out_shape=jax.ShapeDtypeStruct((n_pad, d_out_p), x.dtype),
        grid_spec=pltpu.PrefetchScalarGridSpec(
            num_scalar_prefetch=0,
            grid=grid,
            in_specs=in_specs,
            out_specs=out_specs,
            scratch_shapes=scratch_shapes),
        compiler_params=pltpu.CompilerParams(
            dimension_semantics=dim_sem,
            vmem_limit_bytes=int(vmem_limit_bytes)),
        cost_estimate=cost,
    )(xp, w1p, w2p, gp, bp)

    if n_pad == n and d_out_p == d_out:
        out2 = out                      # fast path: no slice copy
    else:
        out2 = out[:n, :d_out]
    return out2.reshape(*lead_shape, d_out)


def _reference(x, w1_t, w2_t, gamma, beta):
    e1 = x @ w1_t
    h = 0.5 * e1 * (1.0 + jax.lax.erf(e1 * _INV_SQRT2))
    e2 = h @ w2_t
    y = e1 + e2
    mu = jnp.mean(y, axis=-1, keepdims=True)
    var = jnp.mean(jnp.square(y - mu), axis=-1, keepdims=True)
    return (y - mu) * jax.lax.rsqrt(var + _LN_EPS) * gamma + beta


if __name__ == "__main__":
    key = jax.random.PRNGKey(0)
    kx, k1, k2, k3, k4, k5, k6, k7, k8 = jax.random.split(key, 9)

    # --- check 1: shapes implied by the module (small, padded path) --------
    batch, seq, d_in, d_out = 2, 8, 32, 32
    x = jax.random.normal(kx, (batch, seq, d_in), dtype=jnp.float32)
    bound1 = 1.0 / math.sqrt(d_in)
    bound2 = 1.0 / math.sqrt(d_out)
    w1_t = jax.random.uniform(k1, (d_in, d_out), jnp.float32, -bound1, bound1)
    w2_t = jax.random.uniform(k2, (d_out, d_out), jnp.float32, -bound2, bound2)
    gamma = jnp.ones((d_out,), jnp.float32)
    beta = jnp.zeros((d_out,), jnp.float32)

    out = jax.block_until_ready(projection_forward(x, w1_t, w2_t, gamma, beta))
    ref = _reference(x, w1_t, w2_t, gamma, beta)
    assert out.shape == (batch, seq, d_out)
    assert jnp.allclose(out, ref, atol=2e-5, rtol=2e-5), "mismatch vs reference"

    # --- check 2: ragged shapes; forces the k-tiled accumulator kernel -----
    b2, s2, di2, do2 = 3, 20, 200, 72
    xb = jax.random.normal(k3, (b2, s2, di2), dtype=jnp.float32)
    w1b = jax.random.uniform(k4, (di2, do2), jnp.float32,
                             -1.0 / math.sqrt(di2), 1.0 / math.sqrt(di2))
    w2b = jax.random.uniform(k5, (do2, do2), jnp.float32,
                             -1.0 / math.sqrt(do2), 1.0 / math.sqrt(do2))
    gb = jnp.ones((do2,), jnp.float32)
    bb = jnp.zeros((do2,), jnp.float32)

    outb = jax.block_until_ready(
        projection_forward(xb, w1b, w2b, gb, bb, tm=32, tk=128,
                           allow_w1_resident=False))
    refb = _reference(xb, w1b, w2b, gb, bb)
    assert outb.shape == (b2, s2, do2)
    assert jnp.allclose(outb, refb, atol=1e-4, rtol=1e-4), "mismatch (ragged)"

    # --- check 3: fully aligned shapes -> zero-copy fast path (no pad/slice),
    #     W1 resident, auto tile sizing --------------------------------------
    b3, s3, di3, do3 = 2, 128, 128, 128
    xc = jax.random.normal(k6, (b3, s3, di3), dtype=jnp.float32)
    w1c = jax.random.uniform(k7, (di3, do3), jnp.float32,
                             -1.0 / math.sqrt(di3), 1.0 / math.sqrt(di3))
    w2c = jax.random.uniform(k8, (do3, do3), jnp.float32,
                             -1.0 / math.sqrt(do3), 1.0 / math.sqrt(do3))
    gc = jnp.ones((do3,), jnp.float32)
    bc = jnp.zeros((do3,), jnp.float32)

    outc = jax.block_until_ready(projection_forward(xc, w1c, w2c, gc, bc))
    refc = _reference(xc, w1c, w2c, gc, bc)
    assert outc.shape == (b3, s3, do3)
    assert jnp.allclose(outc, refc, atol=1e-4, rtol=1e-4), "mismatch (aligned)"

    print("KERNEL_OK")
</pallas_src>

<mosaic_0001>
module attributes {stable_mosaic.version = 11 : i64} {
  func.func @_projection_kernel_1k(%arg0: i32, %arg1: memref<8x128xf32, #tpu.memory_space<vmem>>, %arg2: memref<128x128xf32, #tpu.memory_space<vmem>>, %arg3: memref<128x128xf32, #tpu.memory_space<vmem>>, %arg4: memref<1x128xf32, #tpu.memory_space<vmem>>, %arg5: memref<1x128xf32, #tpu.memory_space<vmem>>, %arg6: memref<8x128xf32, #tpu.memory_space<vmem>>) attributes {dimension_semantics = [#tpu.dimension_semantics<parallel>], iteration_bounds = array<i64: 2>, scalar_prefetch = 0 : i64, scratch_operands = 0 : i64, tpu.core_type = #tpu.core_type<tc>, window_params = [{transform_indices = @transform_0, window_bounds = array<i64: 8, 128>}, {pipeline_mode = #tpu.pipeline_mode<synchronous>, transform_indices = @transform_1, window_bounds = array<i64: 128, 128>}, {pipeline_mode = #tpu.pipeline_mode<synchronous>, transform_indices = @transform_2, window_bounds = array<i64: 128, 128>}, {pipeline_mode = #tpu.pipeline_mode<synchronous>, transform_indices = @transform_3, window_bounds = array<i64: 1, 128>}, {pipeline_mode = #tpu.pipeline_mode<synchronous>, transform_indices = @transform_4, window_bounds = array<i64: 1, 128>}, {transform_indices = @transform_5, window_bounds = array<i64: 8, 128>}]} {
    %c0 = arith.constant 0 : index
    %c0_0 = arith.constant 0 : index
    %0 = vector.load %arg1[%c0, %c0_0] : memref<8x128xf32, #tpu.memory_space<vmem>>, vector<8x128xf32>
    %c0_1 = arith.constant 0 : index
    %c0_2 = arith.constant 0 : index
    %1 = vector.load %arg2[%c0_1, %c0_2] : memref<128x128xf32, #tpu.memory_space<vmem>>, vector<128x128xf32>
    %cst = arith.constant dense<0.000000e+00> : vector<8x128xf32>
    %2 = tpu.matmul %0, %1, %cst {dimension_numbers = #tpu.dot_dimension_numbers<[1], [0], [0], [1], [0, 0, 1, 1], [], []>} : vector<8x128xf32>, vector<128x128xf32>, vector<8x128xf32> -> vector<8x128xf32>
    %cst_3 = arith.constant 5.000000e-01 : f32
    %3 = vector.broadcast %cst_3 : f32 to vector<8x128xf32>
    %4 = arith.mulf %3, %2 : vector<8x128xf32>
    %cst_4 = arith.constant 0.707106769 : f32
    %5 = vector.broadcast %cst_4 : f32 to vector<8x128xf32>
    %6 = arith.mulf %2, %5 : vector<8x128xf32>
    %7 = math.erf %6 : vector<8x128xf32>
    %cst_5 = arith.constant 1.000000e+00 : f32
    %8 = vector.broadcast %cst_5 : f32 to vector<8x128xf32>
    %9 = arith.addf %8, %7 : vector<8x128xf32>
    %10 = arith.mulf %4, %9 : vector<8x128xf32>
    %c0_6 = arith.constant 0 : index
    %c0_7 = arith.constant 0 : index
    %11 = vector.load %arg3[%c0_6, %c0_7] : memref<128x128xf32, #tpu.memory_space<vmem>>, vector<128x128xf32>
    %cst_8 = arith.constant dense<0.000000e+00> : vector<8x128xf32>
    %12 = tpu.matmul %10, %11, %cst_8 {dimension_numbers = #tpu.dot_dimension_numbers<[1], [0], [0], [1], [0, 0, 1, 1], [], []>} : vector<8x128xf32>, vector<128x128xf32>, vector<8x128xf32> -> vector<8x128xf32>
    %13 = arith.addf %2, %12 : vector<8x128xf32>
    %cst_9 = arith.constant dense<0.000000e+00> : vector<8xf32>
    %14 = vector.multi_reduction <add>, %13, %cst_9 [1] : vector<8x128xf32> to vector<8xf32>
    %15 = vector.shape_cast %14 : vector<8xf32> to vector<8x1xf32>
    %cst_10 = arith.constant 3.125000e-02 : f32
    %16 = vector.broadcast %cst_10 : f32 to vector<8x1xf32>
    %17 = arith.mulf %15, %16 : vector<8x1xf32>
    %18 = vector.broadcast %17 : vector<8x1xf32> to vector<8x128xf32>
    %19 = arith.subf %13, %18 : vector<8x128xf32>
    %20 = tpu.iota {dimensions = array<i32: 1>} : vector<8x128xi32>
    %c32_i32 = arith.constant 32 : i32
    %21 = vector.broadcast %c32_i32 : i32 to vector<8x128xi32>
    %22 = arith.cmpi slt, %20, %21 : vector<8x128xi32>
    %cst_11 = arith.constant 0.000000e+00 : f32
    %23 = vector.broadcast %cst_11 : f32 to vector<8x128xf32>
    %24 = arith.select %22, %19, %23 : vector<8x128xi1>, vector<8x128xf32>
    %25 = arith.mulf %24, %24 : vector<8x128xf32>
    %cst_12 = arith.constant dense<0.000000e+00> : vector<8xf32>
    %26 = vector.multi_reduction <add>, %25, %cst_12 [1] : vector<8x128xf32> to vector<8xf32>
    %27 = vector.shape_cast %26 : vector<8xf32> to vector<8x1xf32>
    %cst_13 = arith.constant 3.125000e-02 : f32
    %28 = vector.broadcast %cst_13 : f32 to vector<8x1xf32>
    %29 = arith.mulf %27, %28 : vector<8x1xf32>
    %cst_14 = arith.constant 9.99999974E-6 : f32
    %30 = vector.broadcast %cst_14 : f32 to vector<8x1xf32>
    %31 = arith.addf %29, %30 : vector<8x1xf32>
    %32 = math.rsqrt %31 : vector<8x1xf32>
    %33 = vector.broadcast %32 : vector<8x1xf32> to vector<8x128xf32>
    %34 = arith.mulf %24, %33 : vector<8x128xf32>
    %c0_15 = arith.constant 0 : index
    %c0_16 = arith.constant 0 : index
    %35 = vector.load %arg4[%c0_15, %c0_16] : memref<1x128xf32, #tpu.memory_space<vmem>>, vector<1x128xf32>
    %36 = vector.broadcast %35 : vector<1x128xf32> to vector<8x128xf32>
    %37 = arith.mulf %34, %36 : vector<8x128xf32>
    %c0_17 = arith.constant 0 : index
    %c0_18 = arith.constant 0 : index
    %38 = vector.load %arg5[%c0_17, %c0_18] : memref<1x128xf32, #tpu.memory_space<vmem>>, vector<1x128xf32>
    %39 = vector.broadcast %38 : vector<1x128xf32> to vector<8x128xf32>
    %40 = arith.addf %37, %39 : vector<8x128xf32>
    %c0_19 = arith.constant 0 : index
    %c0_20 = arith.constant 0 : index
    %41 = vector.load %arg6[%c0_19, %c0_20] : memref<8x128xf32, #tpu.memory_space<vmem>>, vector<8x128xf32>
    tpu.vector_store %arg6[%c0_19, %c0_20], %40 {strides = array<i32>} : memref<8x128xf32, #tpu.memory_space<vmem>>, vector<8x128xf32>,
    return
  }
  func.func @transform_0(%arg0: i32) -> (i32, i32) {
    %c0_i32 = arith.constant 0 : i32
    %c0_i32_0 = arith.constant 0 : i32
    return %arg0, %c0_i32 : i32, i32
  }
  func.func @transform_1(%arg0: i32) -> (i32, i32) {
    %c0_i32 = arith.constant 0 : i32
    %c0_i32_0 = arith.constant 0 : i32
    %c0_i32_1 = arith.constant 0 : i32
    return %c0_i32, %c0_i32_0 : i32, i32
  }
  func.func @transform_2(%arg0: i32) -> (i32, i32) {
    %c0_i32 = arith.constant 0 : i32
    %c0_i32_0 = arith.constant 0 : i32
    %c0_i32_1 = arith.constant 0 : i32
    return %c0_i32, %c0_i32_0 : i32, i32
  }
  func.func @transform_3(%arg0: i32) -> (i32, i32) {
    %c0_i32 = arith.constant 0 : i32
    %c0_i32_0 = arith.constant 0 : i32
    %c0_i32_1 = arith.constant 0 : i32
    return %c0_i32, %c0_i32_0 : i32, i32
  }
  func.func @transform_4(%arg0: i32) -> (i32, i32) {
    %c0_i32 = arith.constant 0 : i32
    %c0_i32_0 = arith.constant 0 : i32
    %c0_i32_1 = arith.constant 0 : i32
    return %c0_i32, %c0_i32_0 : i32, i32
  }
  func.func @transform_5(%arg0: i32) -> (i32, i32) {
    %c0_i32 = arith.constant 0 : i32
    %c0_i32_0 = arith.constant 0 : i32
    return %arg0, %c0_i32 : i32, i32
  }
}

</mosaic_0001>

<bundles_post_ra>
// kernel: tpu_custom_call.1
= control target key start
LH: loop header
LB: loop body
LE: loop exit
PB: predicated region body
PF: predicated region fallthrough
CT: control target
= control target key end

     0   :  { %10 = vsyncpa [#allocation3], 0  ;;  %s1284_s0 = inlined_call_operand.hbm [shape: f32[16,128], index: 0, kind: input, shape index: {}]   ;;  %s1285_s1 = inlined_call_operand.hbm [shape: f32[128,128], index: 1, kind: input, shape index: {}]   ;;  %s1286_s2 = inlined_call_operand.hbm [shape: f32[128,128], index: 2, kind: input, shape index: {}]   ;;  %s1287_s3 = inlined_call_operand.vmem [shape: f32[1,128], index: 3, kind: input, shape index: {}]   ;;  %s1288_s4 = inlined_call_operand.vmem [shape: f32[1,128], index: 4, kind: input, shape index: {}]   ;;  %s1289_s5 = inlined_call_operand.hbm [shape: f32[16,128], index: 5, kind: output, shape index: {}]  }
   0x1   :  { %12 = vsyncpa [#allocation3 + $0x1], 0 }
   0x2   :  { %13 = vsyncpa [#allocation6], 0 }
   0x3   :  { %14 = vsyncpa [#allocation4], 0 }
   0x4   :  { %16 = vsyncpa [#allocation4 + $0x1], 0  ;;  %s1026_s18 = smov 0   ;;  %s1028_s19 = smov 0  }
   0x5   :  { %s1030_s20 = smov 0   ;;  %s1032_s21 = smov 0  }
   0x6 LB: > { %s1047_s22 = sadd.s32 4294967295, %s985_s21   ;;  %s583_s23 = sadd.s32 4294967294, %s985_s21   ;;  %s985_s21 = sphi %s1032_s21, %s1309_s21   ;;  %s981_s20 = sphi %s1030_s20, %s1308_s20   ;;  %s977_s19 = sphi %s1028_s19, %s1307_s19   ;;  %s973_s18 = sphi %s1026_s18, %s1306_s18  }
   0x7   : > { %p42_p0 = scmp.ne.s32.totalorder %s977_s19, %s973_s18  ;;  %p1290_p1 = scmp.eq.s32.totalorder %s1047_s22, 0 }
   0x8   : > { %p156_p3 = scmp.eq.s32.totalorder %s583_s23, 1  ;;  %p584_p5 = scmp.ge.s32.totalorder %s985_s21, 1 }
   0x9   : > { %p1056_p4 = por %p1290_p1, %p42_p0  ;;  %p163_p7 = scmp.lt.s32.totalorder %s985_s21, 3 }
   0xa   : > { %p1061_p6 = por %p156_p3, %p42_p0  ;;  %s987_s27 = smov [#allocation5]  }
   0xb   : > { %s1293_s24 = scalar_select %p1056_p4, 1, 0 }
   0xc   : > { %s1294_s25 = scalar_select %p1061_p6, 1, 0 }
   0xd   : > { %p1066_p8 = pnand %p584_p5, %p163_p7  ;;  %s175_s28 = sshll.u32 %s987_s27, 4  ;;  %s1070_s28 = int_to_ptr.vmem [resolvable:$true] %s175_s28 }
   0xe   : > { %s988_s30 = smov [#allocation7]   ;;  %s829_s9 = scalar_lea.hbm %s1285_s1, 2048 }
   0xf   : > { %p765_p9 = pneg %p1066_p8  ;;  %s188_s6 = sshll.u32 %s988_s30, 4  ;;  %s1081_s6 = int_to_ptr.vmem [resolvable:$true] %s188_s6 }
  0x10   : > { %p830_p12 = scmp.ne.s32.totalorder %s1285_s1, %s829_s9  ;;  %p836_p5 = scmp.lt.u32.totalorder %s829_s9, %s1285_s1 }
  0x11   : > { %p1077_p11 = pnand %p765_p9, %p1290_p1 }
  0x13   : > { %p831_p13 = pneg %p1077_p11 }
  0x15   : > { %p832_p0 = pnand %p831_p13, %p830_p12 }
  0x17   : > { %p833_p3 = pneg %p832_p0 }
  0x19   : > { %p838_p7 = pnand %p836_p5, %p833_p3 }
  0x1b   : > { %841 = shalt.err (!%p838_p7)
}
  0x1c   : > { %s842_s14 = scalar_lea.vmem %s1070_s28, 2048  ;;  %p850_p2 = scmp.lt.s32.totalorder %s1070_s28, %s1070_s28 }
  0x1d   : > { %p843_p9 = scmp.ne.s32.totalorder %s1070_s28, %s842_s14  ;;  %p851_p12 = scmp.lt.s32.totalorder %s842_s14, %s842_s14 }
  0x1f   : > { %p845_p10 = pnand %p843_p9, %p831_p13  ;;  %p852_p0 = por %p851_p12, %p850_p2 }
  0x21   : > { %p846_p1 = pneg %p845_p10 }
  0x23   : > { %p853_p6 = pnand %p852_p0, %p846_p1 }
  0x25   : > { %856 = shalt.err (!%p853_p6)
}
  0x26   : > { %s989_s15 = smov 128   ;;  %s990_s16 = smov 8  }
  0x27   : > { %768 = dma.hbm_to_vmem [thread:$0]  (!%p1077_p11), %s1285_s1, 2048, %s1070_s28, [#allocation6], %s989_s15, %s989_s15, %s990_s16  }
  0x28   : > { %s857_s7 = scalar_lea.hbm %s1286_s2, 2048 }
  0x29   : > { %p858_p2 = scmp.ne.s32.totalorder %s1286_s2, %s857_s7  ;;  %p864_p10 = scmp.lt.u32.totalorder %s857_s7, %s1286_s2 }
  0x2b   : > { %p860_p1 = pnand %p858_p2, %p831_p13 }
  0x2d   : > { %p861_p6 = pneg %p860_p1 }
  0x2f   : > { %p866_p3 = pnand %p864_p10, %p861_p6 }
  0x31   : > { %869 = shalt.err (!%p866_p3)
}
  0x32   : > { %s870_s28 = scalar_lea.vmem %s1081_s6, 2048  ;;  %p878_p12 = scmp.lt.s32.totalorder %s1081_s6, %s1081_s6 }
  0x33   : > { %p871_p5 = scmp.ne.s32.totalorder %s1081_s6, %s870_s28  ;;  %p879_p0 = scmp.lt.s32.totalorder %s870_s28, %s870_s28 }
  0x35   : > { %p873_p7 = pnand %p871_p5, %p831_p13  ;;  %p880_p2 = por %p879_p0, %p878_p12 }
  0x37   : > { %p874_p9 = pneg %p873_p7 }
  0x39   : > { %p881_p1 = pnand %p880_p2, %p874_p9 }
  0x3b   : > { %884 = shalt.err (!%p881_p1)
}
  0x3c   : > { %771 = dma.hbm_to_vmem [thread:$0]  (!%p1077_p11), %s1286_s2, 2048, %s1081_s6, [#allocation6], %s989_s15, %s989_s15, %s990_s16  }
  0x3d   : > { %s1136_s14 = sadd.s32 1, %s985_s21   ;;  %s29_s29 = sadd.s32 1, %s981_s20 }
  0x3e   : > { %s26_s17 = ssub.s32 %s985_s21, %s1136_s14  ;;  %p36_p13 = scmp.ne.s32.totalorder %s981_s20, %s977_s19 }
  0x3f   : > { %p27_p6 = scmp.eq.s32.totalorder %s26_s17, 0  ;;  %p37_p10 = scmp.eq.s32.totalorder %s985_s21, 0 }
  0x40   : > { %p1297_p3 = scmp.eq.s32.totalorder %s1047_s22, 1  ;;  %p782_p7 = scmp.lt.s32.totalorder %s985_s21, 2 }
  0x41   : > { %s1152_s27 = scalar_select %p27_p6, %s981_s20, %s29_s29  }
  0x42   : > { %p1146_p5 = por %p1297_p3, %p36_p13  ;;  %p38_p9 = por %p37_p10, %p36_p13 }
  0x43   : > { %s208_s30 = sand.u32 1, %s981_s20   ;;  %s589_s6 = sshll.u32 %s985_s21, 7 }
  0x44   : > { %s1298_s23 = scalar_select %p1146_p5, 1, 0 }
  0x45   : > { %s588_s7 = sshll.u32 %s208_s30, 3  ;;  %s1159_s8 = scalar_lea.hbm %s1284_s0, %s589_s6 }
  0x46   : > { %s212_s9 = scalar_lea.vmem [#allocation2], %s588_s7  ;;  %p1163_p11 = pnand %p782_p7, %p38_p9 }
  0x47   : > { %s219_s10 = sshll.u32 %s212_s9, 4  ;;  %s209_s28 = scalar_lea.sflag [#allocation3], %s208_s30  ;;  %s1161_s10 = int_to_ptr.vmem [resolvable:$true] %s219_s10 }
  0x48   : > { %s885_s12 = scalar_lea.hbm %s1159_s8, 128  ;;  %p887_p0 = pneg %p1163_p11 }
  0x49   : > { %p886_p12 = scmp.ne.s32.totalorder %s1159_s8, %s885_s12  ;;  %s890_s17 = scalar_lea.hbm %s1284_s0, 256 }
  0x4a   : > { %p891_p13 = scmp.lt.u32.totalorder %s1159_s8, %s1284_s0  ;;  %p892_p6 = scmp.lt.u32.totalorder %s890_s17, %s885_s12 }
  0x4b   : > { %p888_p2 = pnand %p887_p0, %p886_p12  ;;  %p894_p3 = scmp.lt.u32.totalorder %s885_s12, %s1159_s8 }
  0x4c   : > { %p893_p10 = por %p892_p6, %p891_p13 }
  0x4d   : > { %p889_p1 = pneg %p888_p2 }
  0x4e   : > { %p895_p7 = por %p894_p3, %p893_p10 }
  0x50   : > { %p896_p9 = pnand %p895_p7, %p889_p1 }
  0x52   : > { %899 = shalt.err (!%p896_p9)
}
  0x53   : > { %s900_s30 = scalar_lea.vmem %s1161_s10, 128  ;;  %s991_s15 = smov [#allocation2]  }
  0x54   : > { %p901_p12 = scmp.ne.s32.totalorder %s1161_s10, %s900_s30  ;;  %s905_s16 = sshll.u32 %s991_s15, 4  ;;  %s906_s16 = int_to_ptr.vmem [resolvable:$false] %s905_s16 }
  0x55   : > { %s907_s9 = scalar_lea.vmem %s906_s16, 256  ;;  %p908_p4 = scmp.lt.s32.totalorder %s1161_s10, %s906_s16 }
  0x56   : > { %p903_p2 = pnand %p901_p12, %p887_p0  ;;  %p909_p13 = scmp.lt.s32.totalorder %s907_s9, %s900_s30 }
  0x58   : > { %p904_p5 = pneg %p903_p2  ;;  %p910_p6 = por %p909_p13, %p908_p4 }
  0x5a   : > { %p911_p10 = pnand %p910_p6, %p904_p5 }
  0x5c   : > { %914 = shalt.err (!%p911_p10)
}
  0x5d   : > { %775 = dma.hbm_to_vmem [thread:$0]  (!%p1163_p11), %s1159_s8, 128, %s1161_s10, %s209_s28  }
  0x5e   : > { %228 = sbr.rel (%p1066_p8) target bundleno = 908 (0x38c), region = 40  ;;  %s1195_s12 = sand.u32 (!%p1066_p8), 1, %s977_s19  }
  0x5f   : > { %s591_s13 = sshll.u32 (!%p1066_p8), %s1195_s12, 3  ;;  %s231_s29 = scalar_lea.sflag (!%p1066_p8), [#allocation3], %s1195_s12 }
  0x60   : > { %s1201_s17 = scalar_lea.vmem (!%p1066_p8), [#allocation2], %s591_s13  ;;  %p1300_p4 = scmp.ne.s32.totalorder (!%p1066_p8), %s1293_s24, 0 }
  0x65   : > { %960 = dma.done.wait (%p1300_p4), %s231_s29, 128  }
  0x66   : > { %962 = vsyncadd (%p1300_p4), %s231_s29, 4294967168  ;;  %p1301_p5 = scmp.eq.s32.totalorder %s1047_s22, 0 }
  0x68   : > { %964 = dma.done.wait (%p1301_p5), [#allocation6], 4096   ;;  %p1302_p8 = pmov %p1301_p5 }
  0x69   : > { %v992_v0 = vmov 0.0|0.0   ;;  %vm993_vm0 = vmmov 0   ;;  %v994_v1 = vmov 0.0   ;;  %v270_v2 = vld [vmem:[#allocation5] sm:$0xff]  ;;  %v271_v3 = vld [vmem:[#allocation5 + $0x8] sm:$0xff]  ;;  %v272_v4 = vld [vmem:[#allocation5 + $0x10] sm:$0xff]  ;;  %v452_v61 = vlaneseq }
  0x6a   : > { %966 = vsyncadd (%p1302_p8), [#allocation6], 4294963200  ;;  %705 = vmatprep.subr.bf16.mxu0 %v992_v0  ;;  %667 = vmatprep.mubr.msk.f32.mxu0 %vm993_vm0, %v994_v1  ;;  %v706_v5 = vpack.c.bf16 %v271_v3, %v270_v2  ;;  %v273_v6 = vld [vmem:[#allocation5 + $0x18] sm:$0xff]  ;;  %v274_v8 = vld [vmem:[#allocation5 + $0x20] sm:$0xff]  ;;  %s598_s11 = sshll.u32 %s1047_s22, 7  ;;  %s268_s28 = scalar_lea.vmem [#allocation8], %s591_s13 }
  0x6b   : > { %729 = vmatprep.subr.bf16.mxu1 %v992_v0  ;;  %702 = vmatprep.mubr.msk.f32.mxu1 %vm993_vm0, %v994_v1  ;;  %v709_v7 = vpack.c.bf16 %v273_v6, %v272_v4  ;;  %v275_v9 = vld [vmem:[#allocation5 + $0x28] sm:$0xff]  ;;  %v361_v10 = vld [vmem:[#allocation7] sm:$0xff]  ;;  %v363_v12 = vld [vmem:[#allocation7 + $0x10] sm:$0xff]  ;;  %v453_v62 = vand.u32 127, %v452_v61  ;;  %s494_s7 = sshll.u32 %s268_s28, 4  ;;  %s1240_s15 = scalar_lea.hbm %s1289_s5, %s598_s11  ;;  %s1242_s7 = int_to_ptr.vmem [resolvable:$true] %s494_s7 }
  0x6c   : > { %707 = vmatpush3.bf16.msra.mxu0 %v706_v5  ;;  %v362_v11 = vld [vmem:[#allocation7 + $0x8] sm:$0xff]  ;;  %v364_v13 = vld [vmem:[#allocation7 + $0x18] sm:$0xff]  ;;  %v712_v14 = vpack.c.bf16 %v275_v9, %v274_v8  ;;  %v276_v16 = vld [vmem:[#allocation5 + $0x30] sm:$0xff]  ;;  %s481_s16 = scalar_lea.sflag [#allocation4], %s1195_s12  ;;  %s915_s9 = scalar_lea.vmem %s1242_s7, 128 }
  0x6d   : > { %708 = vmatprep.subr.bf16.mxu0 %v992_v0  ;;  %v730_v15 = vpack.c.bf16 %v362_v11, %v361_v10  ;;  %v277_v17 = vld [vmem:[#allocation5 + $0x38] sm:$0xff]  ;;  %v733_v18 = vpack.c.bf16 %v364_v13, %v363_v12  ;;  %v365_v19 = vld [vmem:[#allocation7 + $0x20] sm:$0xff]  ;;  %v366_v20 = vld [vmem:[#allocation7 + $0x28] sm:$0xff]  ;;  %vm454_vm1 = vcmp.lt.s32.totalorder %v453_v62, 32  ;;  %p916_p11 = scmp.ne.s32.totalorder %s1242_s7, %s915_s9  ;;  %p1303_p0 = scmp.ne.s32.totalorder %s1298_s23, 0 }
  0x6e   : > { %v715_v21 = vpack.c.bf16 %v277_v17, %v276_v16  ;;  %v278_v22 = vld [vmem:[#allocation5 + $0x40] sm:$0xff]  ;;  %v279_v23 = vld [vmem:[#allocation5 + $0x48] sm:$0xff]  ;;  %v736_v24 = vpack.c.bf16 %v366_v20, %v365_v19  ;;  %v367_v25 = vld [vmem:[#allocation7 + $0x30] sm:$0xff]  ;;  %s995_s22 = smov [#allocation8]  }
  0x6f   : > { %731 = vmatpush3.bf16.msra.mxu1 %v730_v15  ;;  %v368_v26 = vld [vmem:[#allocation7 + $0x38] sm:$0xff]  ;;  %v718_v27 = vpack.c.bf16 %v279_v23, %v278_v22  ;;  %v280_v28 = vld [vmem:[#allocation5 + $0x50] sm:$0xff]  ;;  %v282_v32 = vld [vmem:[#allocation5 + $0x60] sm:$0xff]  ;;  %p917_p1 = pnand %p916_p11, %p1303_p0  ;;  %s919_s13 = sshll.u32 %s995_s22, 4  ;;  %s920_s13 = int_to_ptr.vmem [resolvable:$false] %s919_s13 }
  0x70   : > { %710 = vmatpush3.bf16.msra.mxu0 %v709_v7  ;;  %732 = vmatprep.subr.bf16.mxu1 %v992_v0  ;;  %v281_v29 = vld [vmem:[#allocation5 + $0x58] sm:$0xff]  ;;  %v739_v30 = vpack.c.bf16 %v368_v26, %v367_v25  ;;  %v283_v33 = vld [vmem:[#allocation5 + $0x68] sm:$0xff]  ;;  %v284_v35 = vld [vmem:[#allocation5 + $0x70] sm:$0xff]  ;;  %s921_s29 = scalar_lea.vmem %s920_s13, 256  ;;  %p922_p7 = scmp.lt.s32.totalorder %s1242_s7, %s920_s13 }
  0x71   : > { %711 = vmatprep.subr.bf16.mxu0 %v992_v0  ;;  %v721_v31 = vpack.c.bf16 %v281_v29, %v280_v28  ;;  %v724_v34 = vpack.c.bf16 %v283_v33, %v282_v32  ;;  %v285_v36 = vld [vmem:[#allocation5 + $0x78] sm:$0xff]  ;;  %v369_v39 = vld [vmem:[#allocation7 + $0x40] sm:$0xff]  ;;  %v370_v40 = vld [vmem:[#allocation7 + $0x48] sm:$0xff]  ;;  %p918_p3 = pneg %p917_p1  ;;  %p923_p9 = scmp.lt.s32.totalorder %s921_s29, %s915_s9 }
  0x72   : > { %v727_v37 = vpack.c.bf16 %v285_v36, %v284_v35  ;;  %v269_v38 = vld [vmem:[%s1201_s17] sm:$0xff]  ;;  %v742_v41 = vpack.c.bf16 %v370_v40, %v369_v39  ;;  %v373_v45 = vld [vmem:[#allocation7 + $0x60] sm:$0xff]  ;;  %v374_v46 = vld [vmem:[#allocation7 + $0x68] sm:$0xff] }
  0x73   : > { %734 = vmatpush3.bf16.msra.mxu1 %v733_v18  ;;  %v371_v42 = vld [vmem:[#allocation7 + $0x50] sm:$0xff]  ;;  %v372_v43 = vld [vmem:[#allocation7 + $0x58] sm:$0xff]  ;;  %v748_v47 = vpack.c.bf16 %v374_v46, %v373_v45  ;;  %p924_p12 = por %p923_p9, %p922_p7 }
  0x74   : > { %713 = vmatpush3.bf16.msra.mxu0 %v712_v14  ;;  %735 = vmatprep.subr.bf16.mxu1 %v992_v0  ;;  %v745_v44 = vpack.c.bf16 %v372_v43, %v371_v42  ;;  %v375_v48 = vld [vmem:[#allocation7 + $0x70] sm:$0xff]  ;;  %v376_v49 = vld [vmem:[#allocation7 + $0x78] sm:$0xff] }
  0x75   : > { %714 = vmatprep.subr.bf16.mxu0 %v992_v0  ;;  %v751_v50 = vpack.c.bf16 %v376_v49, %v375_v48  ;;  %v595_v8 = vld [vmem:[%s1287_s3] ss:$0 sm:$0xff]  ;;  %p925_p2 = pnand %p924_p12, %p918_p3 }
  0x76   : > { %v596_v10 = vld [vmem:[%s1288_s4] ss:$0 sm:$0xff] }
  0x77   : > { %737 = vmatpush3.bf16.msra.mxu1 %v736_v24 }
  0x78   : > { %716 = vmatpush3.bf16.msra.mxu0 %v715_v21  ;;  %738 = vmatprep.subr.bf16.mxu1 %v992_v0 }
  0x79   : > { %717 = vmatprep.subr.bf16.mxu0 %v992_v0 }
  0x7b   : > { %740 = vmatpush3.bf16.msra.mxu1 %v739_v30 }
  0x7c   : > { %719 = vmatpush3.bf16.msra.mxu0 %v718_v27  ;;  %741 = vmatprep.subr.bf16.mxu1 %v992_v0 }
  0x7d   : > { %720 = vmatprep.subr.bf16.mxu0 %v992_v0 }
  0x7f   : > { %743 = vmatpush3.bf16.msra.mxu1 %v742_v41 }
  0x80   : > { %722 = vmatpush3.bf16.msra.mxu0 %v721_v31  ;;  %744 = vmatprep.subr.bf16.mxu1 %v992_v0 }
  0x81   : > { %723 = vmatprep.subr.bf16.mxu0 %v992_v0 }
  0x83   : > { %746 = vmatpush3.bf16.msra.mxu1 %v745_v44 }
  0x84   : > { %725 = vmatpush3.bf16.msra.mxu0 %v724_v34  ;;  %747 = vmatprep.subr.bf16.mxu1 %v992_v0 }
  0x85   : > { %726 = vmatprep.subr.bf16.mxu0 %v992_v0 }
  0x87   : > { %749 = vmatpush3.bf16.msra.mxu1 %v748_v47 }
  0x88   : > { %728 = vmatpush3.bf16.msra.mxu0 %v727_v37  ;;  %750 = vmatprep.subr.bf16.mxu1 %v992_v0 }
  0x8b   : > { %668 = vmatmul.mubr.f32.vlgmr.msra.gmra.mrb[0].mxu0 %v269_v38  ;;  %752 = vmatpush3.bf16.msra.mxu1 %v751_v50 }
 0x15e   : > { %v352_v51 = vpop.f32.mrb[0].mxu0 }
 0x15f   : > { %v357_v52 = vmul.f32 0.70710677, %v352_v51  ;;  %v669_v53 = vpop.f32.mrb[1].mxu0  ;;  %v356_v55 = vmul.f32 0.5, %v352_v51 }
 0x161   : > { %825 = verf.f32 %v357_v52 }
 0x16b   : > { %v826_v54 = vpop.eup %825 }
 0x16c   : > { %v359_v56 = vadd.f32 1.0, %v826_v54 }
 0x16e   : > { %v360_v57 = vmul.f32 %v359_v56, %v356_v55 }
 0x170   : > { %703 = vmatmul.mubr.f32.vlgmr.msra.gmra.mrb[0].mxu1 %v360_v57 }
 0x243   : > { %v443_v58 = vpop.f32.mrb[0].mxu1 }
 0x244   : > { %v447_v59 = vadd.f32 %v443_v58, %v352_v51  ;;  %v704_v60 = vpop.f32.mrb[1].mxu1 }
 0x246   : > { %448 = vadd.xlane.f32.xlu0 %v447_v59 }
 0x2d3   : > { %v449_v63 = vpop.xlane.xlu0 %448 }
 0x2d4   : > { %v450_v0 = vmul.f32 0.03125, %v449_v63 }
 0x2d6   : > { %v451_v1 = vsub.f32 %v447_v59, %v450_v0 }
 0x2d8   : > { %v455_v2 = vsel %vm454_vm1, %v451_v1, 0.0 }
 0x2d9   : > { %v456_v3 = vmul.f32 %v455_v2, %v455_v2 }
 0x2db   : > { %457 = vadd.xlane.f32.xlu0 %v456_v3 }
 0x368   : > { %v458_v4 = vpop.xlane.xlu0 %457 }
 0x369   : > { %v459_v5 = vmul.f32 0.03125, %v458_v4 }
 0x36b   : > { %v460_v6 = vadd.f32 1e-05, %v459_v5 }
 0x36d   : > { %827 = vrsqrt.f32 %v460_v6 }
 0x377   : > { %v828_v7 = vpop.eup %827 }
 0x378   : > { %v462_v9 = vmul.f32 %v828_v7, %v455_v2 }
 0x37a   : > { %v470_v11 = vmul.f32 %v595_v8, %v462_v9 }
 0x37c   : > { %v478_v12 = vadd.f32 %v596_v10, %v470_v11 }
 0x37e   : > { %479 = vst [vmem:[%s268_s28] sm:$0xff] %v478_v12 }
 0x37f   : > { %928 = shalt.err (!%p925_p2)
}
 0x380   : > { %s929_s12 = scalar_lea.hbm %s1240_s15, 128  ;;  %s933_s26 = scalar_lea.hbm %s1289_s5, 256 }
 0x381   : > { %p930_p13 = scmp.ne.s32.totalorder %s1240_s15, %s929_s12  ;;  %p934_p4 = scmp.lt.u32.totalorder %s1240_s15, %s1289_s5 }
 0x382   : > { %p935_p5 = scmp.lt.u32.totalorder %s933_s26, %s929_s12  ;;  %p937_p11 = scmp.lt.u32.totalorder %s929_s12, %s1240_s15 }
 0x383   : > { %p931_p6 = pnand %p930_p13, %p1303_p0 }
 0x384   : > { %p936_p8 = por %p935_p5, %p934_p4 }
 0x385   : > { %p932_p10 = pneg %p931_p6 }
 0x386   : > { %p938_p1 = por %p937_p11, %p936_p8 }
 0x388   : > { %p939_p3 = pnand %p938_p1, %p932_p10 }
 0x38a   : > { %942 = shalt.err (!%p939_p3)
}
 0x38b   : > { %763 = dma.vmem_to_hbm [thread:$0]  (%p1303_p0), %s1242_s7, 128, %s1240_s15, %s481_s16  }
 0x38c PF: > { %s506_s11 = sand.u32 1, %s973_s18   ;;  %p1304_p7 = scmp.ne.s32.totalorder %s1294_s25, 0 }
 0x38d   : > { %p1305_p9 = scmp.ge.s32.totalorder %s985_s21, 2  ;;  %s507_s28 = scalar_lea.sflag [#allocation4], %s506_s11 }
 0x38f   : > { %p777_p12 = pnand %p1305_p9, %p1304_p7 }
 0x391   : > { %968 = dma.done.wait (!%p777_p12), %s507_s28, 128  }
 0x392   : > { %970 = vsyncadd (!%p777_p12), %s507_s28, 4294967168  ;;  %p19_p2 = scmp.ge.s32.totalorder %s1136_s14, 4   ;;  %s1306_s18 = smov %s977_s19 }
 0x393   : > { %s1307_s19 = smov %s981_s20  ;;  %s1308_s20 = smov %s1152_s27 }
 0x394   : > { %s1309_s21 = smov %s1136_s14  ;;  %21 = sbr.rel (!%p19_p2) target bundleno = 6 (0x6), region = 93 }
 0x39b   :  { %512 = vsyncpa [#allocation3], 1 }
 0x39c   :  { %514 = vsyncpa [#allocation3 + $0x1], 1 }
 0x39d   :  { %515 = vsyncpa [#allocation6], 1 }
 0x39e   :  { %516 = vsyncpa [#allocation4], 1 }
 0x39f   :  { %518 = vsyncpa [#allocation4 + $0x1], 1 }

</bundles_post_ra>
